<compile_context>
chip_gen: v5e
topology: v5e:2x2
jax: 0.10.0
libtpu: 0.0.40
codegen_flags: <defaults>
</compile_context>

<pallas_src>
import functools

import jax
import jax.numpy as jnp
from jax import lax
from jax.experimental import pallas as pl
from jax.experimental.pallas import tpu as pltpu


def mha_kernel(q_in_ref, k_in_ref, v_in_ref, wq_ref, wk_ref, wv_ref, wo_ref,
               out_ref, attn_ref, *, n_head):
    """One grid step = one batch element; fully fused MHA forward.

    Block shapes:
      q_in/k_in/v_in : [1, S, D]    bf16 activations
      wq/wk/wv       : [D, D]       bf16 (heads fused along output dim; Wq pre-scaled by 1/sqrt(E))
      wo             : [H, E, D]    bf16 (full block, constant index_map -> VMEM-resident)
      out            : [1, S, D]    f32
      attn           : [1, H, S, S] bf16
    """
    H = n_head
    S = q_in_ref.shape[1]
    D = q_in_ref.shape[2]
    E = D // H

    xq = q_in_ref[0]                    # [S, D] bf16
    xk = k_in_ref[0]
    xv = v_in_ref[0]

    # Fused, lane-dense Q/K/V projections: one [S,D]@[D,D] MXU matmul each,
    # f32 accumulation. (1/sqrt(E) already folded into wq.)
    q = jnp.dot(xq, wq_ref[...], preferred_element_type=jnp.float32)   # [S, D]
    k = jnp.dot(xk, wk_ref[...], preferred_element_type=jnp.float32)
    v = jnp.dot(xv, wv_ref[...], preferred_element_type=jnp.float32)

    acc = jnp.zeros((S, D), dtype=jnp.float32)

    # Static (unrolled) loop over heads; Q/K/V stay in VMEM the whole time.
    for h in range(H):
        qh = q[:, h * E:(h + 1) * E].astype(wq_ref.dtype)               # [S, E]
        kh = k[:, h * E:(h + 1) * E].astype(wk_ref.dtype)
        vh = v[:, h * E:(h + 1) * E].astype(wv_ref.dtype)

        # Scores: contract last axes of both operands -> no explicit K transpose.
        scores = lax.dot_general(
            qh, kh, dimension_numbers=(((1,), (1,)), ((), ())),
            preferred_element_type=jnp.float32)                         # [S, S]

        # Softmax over keys, all in f32. Exact reciprocal so the attention
        # matrix handed back to the caller is properly normalized.
        m = jnp.max(scores, axis=-1, keepdims=True)
        e = jnp.exp(scores - m)
        denom = jnp.sum(e, axis=-1, keepdims=True)
        attn = e * pl.reciprocal(denom, approx=False)
        attn_ref[0, h] = attn.astype(attn_ref.dtype)
        # TODO(synk): dropout on attn / weighted_v / output treated as identity (eval mode).

        # Attention-weighted values: bf16 operands, f32 accumulation.
        weighted = jnp.dot(attn.astype(vh.dtype), vh,
                           preferred_element_type=jnp.float32)          # [S, E]

        # concat-over-heads @ o_w  ==  sum_h weighted_h @ (o_w^T)[h*E:(h+1)*E, :]
        acc = acc + jnp.dot(weighted.astype(wo_ref.dtype), wo_ref[h],
                            preferred_element_type=jnp.float32)         # [S, D]

    out_ref[0] = acc.astype(out_ref.dtype)


def multi_head_attention(query, key, value, wq_heads, wk_heads, wv_heads, wo,
                         n_head, compute_dtype=jnp.bfloat16,
                         attn_dtype=jnp.bfloat16):
    """query/key/value: [B, S, D] f32.
    wq/wk/wv_heads: [H, D, E] (per-head torch Linear weights, already transposed).
    wo: [D, D] torch o_w weight (out_features x in_features).
    Returns (output [B, S, D] f32, attention [B, H, S, S] attn_dtype).
    """
    B, S, D = query.shape
    H = n_head
    E = D // H
    scale = jnp.sqrt(jnp.float32(E))

    # --- host-side weight plumbing -------------------------------------------
    # Fuse per-head projection weights into lane-dense [D, H*E] matrices and
    # fold the 1/sqrt(E) score scaling into Wq (intentional precision trade:
    # bf16 weights / activations, f32 accumulation).
    wq_f = (wq_heads.transpose(1, 0, 2).reshape(D, H * E) / scale).astype(compute_dtype)
    wk_f = wk_heads.transpose(1, 0, 2).reshape(D, H * E).astype(compute_dtype)
    wv_f = wv_heads.transpose(1, 0, 2).reshape(D, H * E).astype(compute_dtype)
    # o_w: output = concat_h(weighted_h) @ wo.T  ->  per-head [E, D] slabs of wo.T.
    wo_heads = wo.T.reshape(H, E, D).astype(compute_dtype)

    # bf16 activations into the kernel -> half the input DMA bytes.
    q_in = query.astype(compute_dtype)
    k_in = key.astype(compute_dtype)
    v_in = value.astype(compute_dtype)

    kernel = functools.partial(mha_kernel, n_head=H)
    attn_bytes = jnp.dtype(attn_dtype).itemsize

    out, attn = pl.pallas_call(
        kernel,
        out_shape=(
            jax.ShapeDtypeStruct((B, S, D), jnp.float32),
            jax.ShapeDtypeStruct((B, H, S, S), attn_dtype),
        ),
        grid_spec=pltpu.PrefetchScalarGridSpec(
            num_scalar_prefetch=0,
            grid=(B,),
            in_specs=[
                pl.BlockSpec((1, S, D), lambda b: (b, 0, 0)),
                pl.BlockSpec((1, S, D), lambda b: (b, 0, 0)),
                pl.BlockSpec((1, S, D), lambda b: (b, 0, 0)),
                pl.BlockSpec((D, H * E), lambda b: (0, 0)),        # constant -> fetched once
                pl.BlockSpec((D, H * E), lambda b: (0, 0)),
                pl.BlockSpec((D, H * E), lambda b: (0, 0)),
                pl.BlockSpec((H, E, D), lambda b: (0, 0, 0)),      # full wo block, VMEM-resident
            ],
            out_specs=[
                pl.BlockSpec((1, S, D), lambda b: (b, 0, 0)),
                pl.BlockSpec((1, H, S, S), lambda b: (b, 0, 0, 0)),
            ],
        ),
        compiler_params=pltpu.CompilerParams(
            dimension_semantics=("parallel",),
            vmem_limit_bytes=48 * 1024 * 1024),   # under v7x's 64 MiB physical VMEM
        cost_estimate=pl.CostEstimate(
            flops=B * (6 * S * D * D + 4 * H * S * S * E + 2 * S * D * D),
            transcendentals=B * H * S * S,
            bytes_accessed=(3 * B * S * D * 2 + 3 * D * D * 2 + H * E * D * 2
                            + B * S * D * 4 + B * H * S * S * attn_bytes)),
    )(q_in, k_in, v_in, wq_f, wk_f, wv_f, wo_heads)

    return out, attn


def reference_mha(query, key, value, wq_heads, wk_heads, wv_heads, wo):
    """Pure-JAX f32 reference reproducing the torch forward (dropout = identity)."""
    B = query.shape[0]
    H, D, E = wq_heads.shape
    scale = jnp.sqrt(jnp.float32(E))
    q = jnp.einsum('bsd,hde->bhse', query, wq_heads)
    k = jnp.einsum('bsd,hde->bhse', key, wk_heads)
    v = jnp.einsum('bsd,hde->bhse', value, wv_heads)
    scores = jnp.einsum('bhqe,bhke->bhqk', q, k) / scale
    attn = jax.nn.softmax(scores, axis=-1)
    weighted = jnp.einsum('bhqk,bhke->bhqe', attn, v)
    concat = weighted.transpose(0, 2, 1, 3).reshape(B, -1, H * E)
    out = concat @ wo.T
    return out, attn


if __name__ == "__main__":
    # Small shapes consistent with the module.
    B, S, D, H = 2, 8, 32, 4          # batch, seq, hidden_dim, n_head
    E = D // H                        # attention_dim per head

    root = jax.random.PRNGKey(0)
    kq, kk, kv, kwq, kwk, kwv, kwo = jax.random.split(root, 7)

    query = jax.random.normal(kq, (B, S, D), dtype=jnp.float32)
    key = jax.random.normal(kk, (B, S, D), dtype=jnp.float32)
    value = jax.random.normal(kv, (B, S, D), dtype=jnp.float32)

    # Per-head q/k/v Linear weights: torch shape [E, D]; stored transposed [H, D, E].
    wq_heads = jax.random.normal(kwq, (H, D, E), dtype=jnp.float32) * 0.1
    wk_heads = jax.random.normal(kwk, (H, D, E), dtype=jnp.float32) * 0.1
    wv_heads = jax.random.normal(kwv, (H, D, E), dtype=jnp.float32) * 0.1
    # o_w Linear weight: torch shape [D, D].
    wo = jax.random.normal(kwo, (D, D), dtype=jnp.float32) * 0.1

    out, attn = multi_head_attention(query, key, value,
                                     wq_heads, wk_heads, wv_heads, wo, H)
    out = jax.block_until_ready(out)
    attn = jax.block_until_ready(attn)

    ref_out, ref_attn = reference_mha(query, key, value,
                                      wq_heads, wk_heads, wv_heads, wo)

    assert out.shape == (B, S, D)
    assert attn.shape == (B, H, S, S)
    # bf16 operands / bf16 attn storage, f32 accumulation -> bf16-appropriate tolerance.
    assert jnp.allclose(out, ref_out, atol=2e-2, rtol=2e-2)
    assert jnp.allclose(attn.astype(jnp.float32), ref_attn, atol=2e-2, rtol=2e-2)

    print("KERNEL_OK")
</pallas_src>

<mosaic_0001>
module attributes {stable_mosaic.version = 11 : i64} {
  func.func @mha_kernel(%arg0: i32, %arg1: memref<1x8x32xbf16, #tpu.memory_space<vmem>>, %arg2: memref<1x8x32xbf16, #tpu.memory_space<vmem>>, %arg3: memref<1x8x32xbf16, #tpu.memory_space<vmem>>, %arg4: memref<32x32xbf16, #tpu.memory_space<vmem>>, %arg5: memref<32x32xbf16, #tpu.memory_space<vmem>>, %arg6: memref<32x32xbf16, #tpu.memory_space<vmem>>, %arg7: memref<4x8x32xbf16, #tpu.memory_space<vmem>>, %arg8: memref<1x8x32xf32, #tpu.memory_space<vmem>>, %arg9: memref<1x4x8x8xbf16, #tpu.memory_space<vmem>>) attributes {dimension_semantics = [#tpu.dimension_semantics<parallel>], iteration_bounds = array<i64: 2>, scalar_prefetch = 0 : i64, scratch_operands = 0 : i64, tpu.core_type = #tpu.core_type<tc>, window_params = [{transform_indices = @transform_0, window_bounds = array<i64: 1, 8, 32>}, {transform_indices = @transform_1, window_bounds = array<i64: 1, 8, 32>}, {transform_indices = @transform_2, window_bounds = array<i64: 1, 8, 32>}, {pipeline_mode = #tpu.pipeline_mode<synchronous>, transform_indices = @transform_3, window_bounds = array<i64: 32, 32>}, {pipeline_mode = #tpu.pipeline_mode<synchronous>, transform_indices = @transform_4, window_bounds = array<i64: 32, 32>}, {pipeline_mode = #tpu.pipeline_mode<synchronous>, transform_indices = @transform_5, window_bounds = array<i64: 32, 32>}, {pipeline_mode = #tpu.pipeline_mode<synchronous>, transform_indices = @transform_6, window_bounds = array<i64: 4, 8, 32>}, {transform_indices = @transform_7, window_bounds = array<i64: 1, 8, 32>}, {transform_indices = @transform_8, window_bounds = array<i64: 1, 4, 8, 8>}]} {
    %c0 = arith.constant 0 : index
    %c0_0 = arith.constant 0 : index
    %c0_1 = arith.constant 0 : index
    %0 = vector.load %arg1[%c0, %c0_0, %c0_1] : memref<1x8x32xbf16, #tpu.memory_space<vmem>>, vector<1x8x32xbf16>
    %1 = vector.shape_cast %0 : vector<1x8x32xbf16> to vector<8x32xbf16>
    %c0_2 = arith.constant 0 : index
    %c0_3 = arith.constant 0 : index
    %c0_4 = arith.constant 0 : index
    %2 = vector.load %arg2[%c0_2, %c0_3, %c0_4] : memref<1x8x32xbf16, #tpu.memory_space<vmem>>, vector<1x8x32xbf16>
    %3 = vector.shape_cast %2 : vector<1x8x32xbf16> to vector<8x32xbf16>
    %c0_5 = arith.constant 0 : index
    %c0_6 = arith.constant 0 : index
    %c0_7 = arith.constant 0 : index
    %4 = vector.load %arg3[%c0_5, %c0_6, %c0_7] : memref<1x8x32xbf16, #tpu.memory_space<vmem>>, vector<1x8x32xbf16>
    %5 = vector.shape_cast %4 : vector<1x8x32xbf16> to vector<8x32xbf16>
    %c0_8 = arith.constant 0 : index
    %c0_9 = arith.constant 0 : index
    %6 = vector.load %arg4[%c0_8, %c0_9] : memref<32x32xbf16, #tpu.memory_space<vmem>>, vector<32x32xbf16>
    %cst = arith.constant dense<0.000000e+00> : vector<8x32xf32>
    %7 = tpu.matmul %1, %6, %cst {dimension_numbers = #tpu.dot_dimension_numbers<[1], [0], [0], [1], [0, 0, 1, 1], [], []>} : vector<8x32xbf16>, vector<32x32xbf16>, vector<8x32xf32> -> vector<8x32xf32>
    %c0_10 = arith.constant 0 : index
    %c0_11 = arith.constant 0 : index
    %8 = vector.load %arg5[%c0_10, %c0_11] : memref<32x32xbf16, #tpu.memory_space<vmem>>, vector<32x32xbf16>
    %cst_12 = arith.constant dense<0.000000e+00> : vector<8x32xf32>
    %9 = tpu.matmul %3, %8, %cst_12 {dimension_numbers = #tpu.dot_dimension_numbers<[1], [0], [0], [1], [0, 0, 1, 1], [], []>} : vector<8x32xbf16>, vector<32x32xbf16>, vector<8x32xf32> -> vector<8x32xf32>
    %c0_13 = arith.constant 0 : index
    %c0_14 = arith.constant 0 : index
    %10 = vector.load %arg6[%c0_13, %c0_14] : memref<32x32xbf16, #tpu.memory_space<vmem>>, vector<32x32xbf16>
    %cst_15 = arith.constant dense<0.000000e+00> : vector<8x32xf32>
    %11 = tpu.matmul %5, %10, %cst_15 {dimension_numbers = #tpu.dot_dimension_numbers<[1], [0], [0], [1], [0, 0, 1, 1], [], []>} : vector<8x32xbf16>, vector<32x32xbf16>, vector<8x32xf32> -> vector<8x32xf32>
    %cst_16 = arith.constant 0.000000e+00 : f32
    %12 = vector.broadcast %cst_16 : f32 to vector<8x32xf32>
    %13 = vector.extract_strided_slice %7 {offsets = [0, 0], sizes = [8, 8], strides = [1, 1]} : vector<8x32xf32> to vector<8x8xf32>
    %14 = arith.truncf %13 : vector<8x8xf32> to vector<8x8xbf16>
    %15 = vector.extract_strided_slice %9 {offsets = [0, 0], sizes = [8, 8], strides = [1, 1]} : vector<8x32xf32> to vector<8x8xf32>
    %16 = arith.truncf %15 : vector<8x8xf32> to vector<8x8xbf16>
    %17 = vector.extract_strided_slice %11 {offsets = [0, 0], sizes = [8, 8], strides = [1, 1]} : vector<8x32xf32> to vector<8x8xf32>
    %18 = arith.truncf %17 : vector<8x8xf32> to vector<8x8xbf16>
    %cst_17 = arith.constant dense<0.000000e+00> : vector<8x8xf32>
    %19 = tpu.matmul %14, %16, %cst_17 {dimension_numbers = #tpu.dot_dimension_numbers<[1], [1], [0], [0], [0, 0, 1, 0], [], []>} : vector<8x8xbf16>, vector<8x8xbf16>, vector<8x8xf32> -> vector<8x8xf32>
    %cst_18 = arith.constant dense<0xFF800000> : vector<8xf32>
    %20 = vector.multi_reduction <maximumf>, %19, %cst_18 [1] : vector<8x8xf32> to vector<8xf32>
    %21 = vector.shape_cast %20 : vector<8xf32> to vector<8x1xf32>
    %22 = vector.broadcast %21 : vector<8x1xf32> to vector<8x8xf32>
    %23 = arith.subf %19, %22 : vector<8x8xf32>
    %24 = math.exp %23 : vector<8x8xf32>
    %cst_19 = arith.constant dense<0.000000e+00> : vector<8xf32>
    %25 = vector.multi_reduction <add>, %24, %cst_19 [1] : vector<8x8xf32> to vector<8xf32>
    %26 = vector.shape_cast %25 : vector<8xf32> to vector<8x1xf32>
    %27 = tpu.reciprocal %26 : vector<8x1xf32> -> vector<8x1xf32>
    %28 = vector.broadcast %27 : vector<8x1xf32> to vector<8x8xf32>
    %29 = arith.mulf %24, %28 : vector<8x8xf32>
    %30 = arith.truncf %29 : vector<8x8xf32> to vector<8x8xbf16>
    %c0_20 = arith.constant 0 : index
    %c0_21 = arith.constant 0 : index
    %c0_22 = arith.constant 0 : index
    %c0_23 = arith.constant 0 : index
    %31 = vector.load %arg9[%c0_20, %c0_21, %c0_22, %c0_23] : memref<1x4x8x8xbf16, #tpu.memory_space<vmem>>, vector<1x1x8x8xbf16>
    %32 = vector.shape_cast %31 : vector<1x1x8x8xbf16> to vector<8x8xbf16>
    %33 = vector.shape_cast %30 : vector<8x8xbf16> to vector<1x1x8x8xbf16>
    tpu.vector_store %arg9[%c0_20, %c0_21, %c0_22, %c0_23], %33 {strides = array<i32>} : memref<1x4x8x8xbf16, #tpu.memory_space<vmem>>, vector<1x1x8x8xbf16>,
    %34 = arith.truncf %29 : vector<8x8xf32> to vector<8x8xbf16>
    %cst_24 = arith.constant dense<0.000000e+00> : vector<8x8xf32>
    %35 = tpu.matmul %34, %18, %cst_24 {dimension_numbers = #tpu.dot_dimension_numbers<[1], [0], [0], [1], [0, 0, 1, 1], [], []>} : vector<8x8xbf16>, vector<8x8xbf16>, vector<8x8xf32> -> vector<8x8xf32>
    %36 = arith.truncf %35 : vector<8x8xf32> to vector<8x8xbf16>
    %c0_25 = arith.constant 0 : index
    %c0_26 = arith.constant 0 : index
    %c0_27 = arith.constant 0 : index
    %37 = vector.load %arg7[%c0_25, %c0_26, %c0_27] : memref<4x8x32xbf16, #tpu.memory_space<vmem>>, vector<1x8x32xbf16>
    %38 = vector.shape_cast %37 : vector<1x8x32xbf16> to vector<8x32xbf16>
    %cst_28 = arith.constant dense<0.000000e+00> : vector<8x32xf32>
    %39 = tpu.matmul %36, %38, %cst_28 {dimension_numbers = #tpu.dot_dimension_numbers<[1], [0], [0], [1], [0, 0, 1, 1], [], []>} : vector<8x8xbf16>, vector<8x32xbf16>, vector<8x32xf32> -> vector<8x32xf32>
    %40 = arith.addf %12, %39 : vector<8x32xf32>
    %41 = vector.extract_strided_slice %7 {offsets = [0, 8], sizes = [8, 8], strides = [1, 1]} : vector<8x32xf32> to vector<8x8xf32>
    %42 = arith.truncf %41 : vector<8x8xf32> to vector<8x8xbf16>
    %43 = vector.extract_strided_slice %9 {offsets = [0, 8], sizes = [8, 8], strides = [1, 1]} : vector<8x32xf32> to vector<8x8xf32>
    %44 = arith.truncf %43 : vector<8x8xf32> to vector<8x8xbf16>
    %45 = vector.extract_strided_slice %11 {offsets = [0, 8], sizes = [8, 8], strides = [1, 1]} : vector<8x32xf32> to vector<8x8xf32>
    %46 = arith.truncf %45 : vector<8x8xf32> to vector<8x8xbf16>
    %cst_29 = arith.constant dense<0.000000e+00> : vector<8x8xf32>
    %47 = tpu.matmul %42, %44, %cst_29 {dimension_numbers = #tpu.dot_dimension_numbers<[1], [1], [0], [0], [0, 0, 1, 0], [], []>} : vector<8x8xbf16>, vector<8x8xbf16>, vector<8x8xf32> -> vector<8x8xf32>
    %cst_30 = arith.constant dense<0xFF800000> : vector<8xf32>
    %48 = vector.multi_reduction <maximumf>, %47, %cst_30 [1] : vector<8x8xf32> to vector<8xf32>
    %49 = vector.shape_cast %48 : vector<8xf32> to vector<8x1xf32>
    %50 = vector.broadcast %49 : vector<8x1xf32> to vector<8x8xf32>
    %51 = arith.subf %47, %50 : vector<8x8xf32>
    %52 = math.exp %51 : vector<8x8xf32>
    %cst_31 = arith.constant dense<0.000000e+00> : vector<8xf32>
    %53 = vector.multi_reduction <add>, %52, %cst_31 [1] : vector<8x8xf32> to vector<8xf32>
    %54 = vector.shape_cast %53 : vector<8xf32> to vector<8x1xf32>
    %55 = tpu.reciprocal %54 : vector<8x1xf32> -> vector<8x1xf32>
    %56 = vector.broadcast %55 : vector<8x1xf32> to vector<8x8xf32>
    %57 = arith.mulf %52, %56 : vector<8x8xf32>
    %58 = arith.truncf %57 : vector<8x8xf32> to vector<8x8xbf16>
    %c0_32 = arith.constant 0 : index
    %c1 = arith.constant 1 : index
    %c0_33 = arith.constant 0 : index
    %c0_34 = arith.constant 0 : index
    %59 = vector.load %arg9[%c0_32, %c1, %c0_33, %c0_34] : memref<1x4x8x8xbf16, #tpu.memory_space<vmem>>, vector<1x1x8x8xbf16>
    %60 = vector.shape_cast %59 : vector<1x1x8x8xbf16> to vector<8x8xbf16>
    %61 = vector.shape_cast %58 : vector<8x8xbf16> to vector<1x1x8x8xbf16>
    tpu.vector_store %arg9[%c0_32, %c1, %c0_33, %c0_34], %61 {strides = array<i32>} : memref<1x4x8x8xbf16, #tpu.memory_space<vmem>>, vector<1x1x8x8xbf16>,
    %62 = arith.truncf %57 : vector<8x8xf32> to vector<8x8xbf16>
    %cst_35 = arith.constant dense<0.000000e+00> : vector<8x8xf32>
    %63 = tpu.matmul %62, %46, %cst_35 {dimension_numbers = #tpu.dot_dimension_numbers<[1], [0], [0], [1], [0, 0, 1, 1], [], []>} : vector<8x8xbf16>, vector<8x8xbf16>, vector<8x8xf32> -> vector<8x8xf32>
    %64 = arith.truncf %63 : vector<8x8xf32> to vector<8x8xbf16>
    %c1_36 = arith.constant 1 : index
    %c0_37 = arith.constant 0 : index
    %c0_38 = arith.constant 0 : index
    %65 = vector.load %arg7[%c1_36, %c0_37, %c0_38] : memref<4x8x32xbf16, #tpu.memory_space<vmem>>, vector<1x8x32xbf16>
    %66 = vector.shape_cast %65 : vector<1x8x32xbf16> to vector<8x32xbf16>
    %cst_39 = arith.constant dense<0.000000e+00> : vector<8x32xf32>
    %67 = tpu.matmul %64, %66, %cst_39 {dimension_numbers = #tpu.dot_dimension_numbers<[1], [0], [0], [1], [0, 0, 1, 1], [], []>} : vector<8x8xbf16>, vector<8x32xbf16>, vector<8x32xf32> -> vector<8x32xf32>
    %68 = arith.addf %40, %67 : vector<8x32xf32>
    %69 = vector.extract_strided_slice %7 {offsets = [0, 16], sizes = [8, 8], strides = [1, 1]} : vector<8x32xf32> to vector<8x8xf32>
    %70 = arith.truncf %69 : vector<8x8xf32> to vector<8x8xbf16>
    %71 = vector.extract_strided_slice %9 {offsets = [0, 16], sizes = [8, 8], strides = [1, 1]} : vector<8x32xf32> to vector<8x8xf32>
    %72 = arith.truncf %71 : vector<8x8xf32> to vector<8x8xbf16>
    %73 = vector.extract_strided_slice %11 {offsets = [0, 16], sizes = [8, 8], strides = [1, 1]} : vector<8x32xf32> to vector<8x8xf32>
    %74 = arith.truncf %73 : vector<8x8xf32> to vector<8x8xbf16>
    %cst_40 = arith.constant dense<0.000000e+00> : vector<8x8xf32>
    %75 = tpu.matmul %70, %72, %cst_40 {dimension_numbers = #tpu.dot_dimension_numbers<[1], [1], [0], [0], [0, 0, 1, 0], [], []>} : vector<8x8xbf16>, vector<8x8xbf16>, vector<8x8xf32> -> vector<8x8xf32>
    %cst_41 = arith.constant dense<0xFF800000> : vector<8xf32>
    %76 = vector.multi_reduction <maximumf>, %75, %cst_41 [1] : vector<8x8xf32> to vector<8xf32>
    %77 = vector.shape_cast %76 : vector<8xf32> to vector<8x1xf32>
    %78 = vector.broadcast %77 : vector<8x1xf32> to vector<8x8xf32>
    %79 = arith.subf %75, %78 : vector<8x8xf32>
    %80 = math.exp %79 : vector<8x8xf32>
    %cst_42 = arith.constant dense<0.000000e+00> : vector<8xf32>
    %81 = vector.multi_reduction <add>, %80, %cst_42 [1] : vector<8x8xf32> to vector<8xf32>
    %82 = vector.shape_cast %81 : vector<8xf32> to vector<8x1xf32>
    %83 = tpu.reciprocal %82 : vector<8x1xf32> -> vector<8x1xf32>
    %84 = vector.broadcast %83 : vector<8x1xf32> to vector<8x8xf32>
    %85 = arith.mulf %80, %84 : vector<8x8xf32>
    %86 = arith.truncf %85 : vector<8x8xf32> to vector<8x8xbf16>
    %c0_43 = arith.constant 0 : index
    %c2 = arith.constant 2 : index
    %c0_44 = arith.constant 0 : index
    %c0_45 = arith.constant 0 : index
    %87 = vector.load %arg9[%c0_43, %c2, %c0_44, %c0_45] : memref<1x4x8x8xbf16, #tpu.memory_space<vmem>>, vector<1x1x8x8xbf16>
    %88 = vector.shape_cast %87 : vector<1x1x8x8xbf16> to vector<8x8xbf16>
    %89 = vector.shape_cast %86 : vector<8x8xbf16> to vector<1x1x8x8xbf16>
    tpu.vector_store %arg9[%c0_43, %c2, %c0_44, %c0_45], %89 {strides = array<i32>} : memref<1x4x8x8xbf16, #tpu.memory_space<vmem>>, vector<1x1x8x8xbf16>,
    %90 = arith.truncf %85 : vector<8x8xf32> to vector<8x8xbf16>
    %cst_46 = arith.constant dense<0.000000e+00> : vector<8x8xf32>
    %91 = tpu.matmul %90, %74, %cst_46 {dimension_numbers = #tpu.dot_dimension_numbers<[1], [0], [0], [1], [0, 0, 1, 1], [], []>} : vector<8x8xbf16>, vector<8x8xbf16>, vector<8x8xf32> -> vector<8x8xf32>
    %92 = arith.truncf %91 : vector<8x8xf32> to vector<8x8xbf16>
    %c2_47 = arith.constant 2 : index
    %c0_48 = arith.constant 0 : index
    %c0_49 = arith.constant 0 : index
    %93 = vector.load %arg7[%c2_47, %c0_48, %c0_49] : memref<4x8x32xbf16, #tpu.memory_space<vmem>>, vector<1x8x32xbf16>
    %94 = vector.shape_cast %93 : vector<1x8x32xbf16> to vector<8x32xbf16>
    %cst_50 = arith.constant dense<0.000000e+00> : vector<8x32xf32>
    %95 = tpu.matmul %92, %94, %cst_50 {dimension_numbers = #tpu.dot_dimension_numbers<[1], [0], [0], [1], [0, 0, 1, 1], [], []>} : vector<8x8xbf16>, vector<8x32xbf16>, vector<8x32xf32> -> vector<8x32xf32>
    %96 = arith.addf %68, %95 : vector<8x32xf32>
    %97 = vector.extract_strided_slice %7 {offsets = [0, 24], sizes = [8, 8], strides = [1, 1]} : vector<8x32xf32> to vector<8x8xf32>
    %98 = arith.truncf %97 : vector<8x8xf32> to vector<8x8xbf16>
    %99 = vector.extract_strided_slice %9 {offsets = [0, 24], sizes = [8, 8], strides = [1, 1]} : vector<8x32xf32> to vector<8x8xf32>
    %100 = arith.truncf %99 : vector<8x8xf32> to vector<8x8xbf16>
    %101 = vector.extract_strided_slice %11 {offsets = [0, 24], sizes = [8, 8], strides = [1, 1]} : vector<8x32xf32> to vector<8x8xf32>
    %102 = arith.truncf %101 : vector<8x8xf32> to vector<8x8xbf16>
    %cst_51 = arith.constant dense<0.000000e+00> : vector<8x8xf32>
    %103 = tpu.matmul %98, %100, %cst_51 {dimension_numbers = #tpu.dot_dimension_numbers<[1], [1], [0], [0], [0, 0, 1, 0], [], []>} : vector<8x8xbf16>, vector<8x8xbf16>, vector<8x8xf32> -> vector<8x8xf32>
    %cst_52 = arith.constant dense<0xFF800000> : vector<8xf32>
    %104 = vector.multi_reduction <maximumf>, %103, %cst_52 [1] : vector<8x8xf32> to vector<8xf32>
    %105 = vector.shape_cast %104 : vector<8xf32> to vector<8x1xf32>
    %106 = vector.broadcast %105 : vector<8x1xf32> to vector<8x8xf32>
    %107 = arith.subf %103, %106 : vector<8x8xf32>
    %108 = math.exp %107 : vector<8x8xf32>
    %cst_53 = arith.constant dense<0.000000e+00> : vector<8xf32>
    %109 = vector.multi_reduction <add>, %108, %cst_53 [1] : vector<8x8xf32> to vector<8xf32>
    %110 = vector.shape_cast %109 : vector<8xf32> to vector<8x1xf32>
    %111 = tpu.reciprocal %110 : vector<8x1xf32> -> vector<8x1xf32>
    %112 = vector.broadcast %111 : vector<8x1xf32> to vector<8x8xf32>
    %113 = arith.mulf %108, %112 : vector<8x8xf32>
    %114 = arith.truncf %113 : vector<8x8xf32> to vector<8x8xbf16>
    %c0_54 = arith.constant 0 : index
    %c3 = arith.constant 3 : index
    %c0_55 = arith.constant 0 : index
    %c0_56 = arith.constant 0 : index
    %115 = vector.load %arg9[%c0_54, %c3, %c0_55, %c0_56] : memref<1x4x8x8xbf16, #tpu.memory_space<vmem>>, vector<1x1x8x8xbf16>
    %116 = vector.shape_cast %115 : vector<1x1x8x8xbf16> to vector<8x8xbf16>
    %117 = vector.shape_cast %114 : vector<8x8xbf16> to vector<1x1x8x8xbf16>
    tpu.vector_store %arg9[%c0_54, %c3, %c0_55, %c0_56], %117 {strides = array<i32>} : memref<1x4x8x8xbf16, #tpu.memory_space<vmem>>, vector<1x1x8x8xbf16>,
    %118 = arith.truncf %113 : vector<8x8xf32> to vector<8x8xbf16>
    %cst_57 = arith.constant dense<0.000000e+00> : vector<8x8xf32>
    %119 = tpu.matmul %118, %102, %cst_57 {dimension_numbers = #tpu.dot_dimension_numbers<[1], [0], [0], [1], [0, 0, 1, 1], [], []>} : vector<8x8xbf16>, vector<8x8xbf16>, vector<8x8xf32> -> vector<8x8xf32>
    %120 = arith.truncf %119 : vector<8x8xf32> to vector<8x8xbf16>
    %c3_58 = arith.constant 3 : index
    %c0_59 = arith.constant 0 : index
    %c0_60 = arith.constant 0 : index
    %121 = vector.load %arg7[%c3_58, %c0_59, %c0_60] : memref<4x8x32xbf16, #tpu.memory_space<vmem>>, vector<1x8x32xbf16>
    %122 = vector.shape_cast %121 : vector<1x8x32xbf16> to vector<8x32xbf16>
    %cst_61 = arith.constant dense<0.000000e+00> : vector<8x32xf32>
    %123 = tpu.matmul %120, %122, %cst_61 {dimension_numbers = #tpu.dot_dimension_numbers<[1], [0], [0], [1], [0, 0, 1, 1], [], []>} : vector<8x8xbf16>, vector<8x32xbf16>, vector<8x32xf32> -> vector<8x32xf32>
    %124 = arith.addf %96, %123 : vector<8x32xf32>
    %c0_62 = arith.constant 0 : index
    %c0_63 = arith.constant 0 : index
    %c0_64 = arith.constant 0 : index
    %125 = vector.load %arg8[%c0_62, %c0_63, %c0_64] : memref<1x8x32xf32, #tpu.memory_space<vmem>>, vector<1x8x32xf32>
    %126 = vector.shape_cast %125 : vector<1x8x32xf32> to vector<8x32xf32>
    %127 = vector.shape_cast %124 : vector<8x32xf32> to vector<1x8x32xf32>
    tpu.vector_store %arg8[%c0_62, %c0_63, %c0_64], %127 {strides = array<i32>} : memref<1x8x32xf32, #tpu.memory_space<vmem>>, vector<1x8x32xf32>,
    return
  }
  func.func @transform_0(%arg0: i32) -> (i32, i32, i32) {
    %c0_i32 = arith.constant 0 : i32
    %c0_i32_0 = arith.constant 0 : i32
    %c0_i32_1 = arith.constant 0 : i32
    return %arg0, %c0_i32, %c0_i32_0 : i32, i32, i32
  }
  func.func @transform_1(%arg0: i32) -> (i32, i32, i32) {
    %c0_i32 = arith.constant 0 : i32
    %c0_i32_0 = arith.constant 0 : i32
    %c0_i32_1 = arith.constant 0 : i32
    return %arg0, %c0_i32, %c0_i32_0 : i32, i32, i32
  }
  func.func @transform_2(%arg0: i32) -> (i32, i32, i32) {
    %c0_i32 = arith.constant 0 : i32
    %c0_i32_0 = arith.constant 0 : i32
    %c0_i32_1 = arith.constant 0 : i32
    return %arg0, %c0_i32, %c0_i32_0 : i32, i32, i32
  }
  func.func @transform_3(%arg0: i32) -> (i32, i32) {
    %c0_i32 = arith.constant 0 : i32
    %c0_i32_0 = arith.constant 0 : i32
    %c0_i32_1 = arith.constant 0 : i32
    return %c0_i32, %c0_i32_0 : i32, i32
  }
  func.func @transform_4(%arg0: i32) -> (i32, i32) {
    %c0_i32 = arith.constant 0 : i32
    %c0_i32_0 = arith.constant 0 : i32
    %c0_i32_1 = arith.constant 0 : i32
    return %c0_i32, %c0_i32_0 : i32, i32
  }
  func.func @transform_5(%arg0: i32) -> (i32, i32) {
    %c0_i32 = arith.constant 0 : i32
    %c0_i32_0 = arith.constant 0 : i32
    %c0_i32_1 = arith.constant 0 : i32
    return %c0_i32, %c0_i32_0 : i32, i32
  }
  func.func @transform_6(%arg0: i32) -> (i32, i32, i32) {
    %c0_i32 = arith.constant 0 : i32
    %c0_i32_0 = arith.constant 0 : i32
    %c0_i32_1 = arith.constant 0 : i32
    %c0_i32_2 = arith.constant 0 : i32
    return %c0_i32, %c0_i32_0, %c0_i32_1 : i32, i32, i32
  }
  func.func @transform_7(%arg0: i32) -> (i32, i32, i32) {
    %c0_i32 = arith.constant 0 : i32
    %c0_i32_0 = arith.constant 0 : i32
    %c0_i32_1 = arith.constant 0 : i32
    return %arg0, %c0_i32, %c0_i32_0 : i32, i32, i32
  }
  func.func @transform_8(%arg0: i32) -> (i32, i32, i32, i32) {
    %c0_i32 = arith.constant 0 : i32
    %c0_i32_0 = arith.constant 0 : i32
    %c0_i32_1 = arith.constant 0 : i32
    %c0_i32_2 = arith.constant 0 : i32
    return %arg0, %c0_i32, %c0_i32_0, %c0_i32_1 : i32, i32, i32, i32
  }
}

</mosaic_0001>

<bundles_post_ra>
// kernel: tpu_custom_call.1
= control target key start
LH: loop header
LB: loop body
LE: loop exit
PB: predicated region body
PF: predicated region fallthrough
CT: control target
= control target key end

     0   :  { %s2073_s0 = inlined_call_operand.hbm [shape: bf16[2,8,32], index: 0, kind: input, shape index: {}]   ;;  %s2074_s1 = inlined_call_operand.hbm [shape: bf16[2,8,32], index: 1, kind: input, shape index: {}]   ;;  %s2075_s2 = inlined_call_operand.hbm [shape: bf16[2,8,32], index: 2, kind: input, shape index: {}]   ;;  %s2076_s3 = inlined_call_operand.hbm [shape: bf16[32,32], index: 3, kind: input, shape index: {}]   ;;  %s2077_s4 = inlined_call_operand.hbm [shape: bf16[32,32], index: 4, kind: input, shape index: {}]   ;;  %s2078_s5 = inlined_call_operand.hbm [shape: bf16[32,32], index: 5, kind: input, shape index: {}]   ;;  %s2079_s6 = inlined_call_operand.hbm [shape: bf16[4,8,32], index: 6, kind: input, shape index: {}]   ;;  %s2080_s7 = inlined_call_operand.hbm [shape: f32[2,8,32], index: 7, kind: output, shape index: {0}]   ;;  %s2081_s8 = inlined_call_operand.hbm [shape: bf16[2,4,8,8], index: 8, kind: output, shape index: {1}]  }
   0x1   :  { %2091 = sst [smem:[#allocation26_spill]] %s2074_s1 }
   0x2   :  { %2092 = sst [smem:[#allocation27_spill]] %s2076_s3 }
   0x3   :  { %2093 = sst [smem:[#allocation28_spill]] %s2077_s4 }
   0x4   :  { %2094 = sst [smem:[#allocation29_spill]] %s2078_s5 }
   0x5   :  { %2095 = sst [smem:[#allocation30_spill]] %s2079_s6 }
   0x6   :  { %14 = vsyncpa [#allocation3], 0 }
   0x7   :  { %16 = vsyncpa [#allocation3 + $0x1], 0 }
   0x8   :  { %17 = vsyncpa [#allocation6], 0 }
   0x9   :  { %19 = vsyncpa [#allocation6 + $0x1], 0 }
   0xa   :  { %20 = vsyncpa [#allocation9], 0 }
   0xb   :  { %21 = vsyncpa [#allocation12], 0 }
   0xc   :  { %22 = vsyncpa [#allocation4], 0 }
   0xd   :  { %24 = vsyncpa [#allocation4 + $0x1], 0 }
   0xe   :  { %25 = vsyncpa [#allocation16], 0 }
   0xf   :  { %27 = vsyncpa [#allocation16 + $0x1], 0  ;;  %s1756_s27 = smov 0   ;;  %s1758_s28 = smov 0  }
  0x10   :  { %s1760_s29 = smov 0   ;;  %s1762_s30 = smov 0  }
  0x11 LB: > { %2096 = sst [smem:[#allocation23_spill]] %s1698_s30  ;;  %s1780_s12 = sadd.s32 4294967295, %s1698_s30   ;;  %s1698_s30 = sphi %s1762_s30, %s2119_s30   ;;  %s1694_s29 = sphi %s1760_s29, %s2123_s29   ;;  %s1690_s28 = sphi %s1758_s28, %s2122_s28   ;;  %s1686_s27 = sphi %s1756_s27, %s2121_s27  }
  0x12   : > { %s2097_s3 = sld [smem:[#allocation27_spill]]  ;;  %p1175_p0 = scmp.ge.s32.totalorder %s1698_s30, 1 }
  0x13   : > { %p2089_p1 = scmp.eq.s32.totalorder %s1780_s12, 0  ;;  %p252_p2 = scmp.lt.s32.totalorder %s1698_s30, 3 }
  0x14   : > { %s1700_s14 = smov [#allocation8]   ;;  %s2099_s5 = sld [smem:[#allocation29_spill]] }
  0x15   : > { %p1785_p3 = pnand %p1175_p0, %p252_p2  ;;  %s265_s15 = sshll.u32 %s1700_s14, 4  ;;  %s266_s15 = int_to_ptr.vmem [resolvable:$true] %s265_s15 }
  0x16   : > { %s1701_s20 = smov [#allocation11]   ;;  %s2082_s22 = smov 64  }
  0x17   : > { %p1279_p4 = pneg %p1785_p3  ;;  %s293_s21 = sshll.u32 %s1701_s20, 4  ;;  %s294_s21 = int_to_ptr.vmem [resolvable:$true] %s293_s21 }
  0x18   : > { %s263_s11 = sshll.u32 %s2097_s3, 4  ;;  %s2084_s23 = smov 4   ;;  %s264_s11 = int_to_ptr.hbm [resolvable:$true] %s263_s11 }
  0x19   : > { %p1797_p6 = pnand %p1279_p4, %p2089_p1  ;;  %s1174_s24 = sadd.s32 4294967294, %s1698_s30  }
  0x1a   : > { %s291_s18 = sshll.u32 %s2099_s5, 4  ;;  %s1813_s25 = sadd.s32 1, %s1698_s30   ;;  %s292_s18 = int_to_ptr.hbm [resolvable:$true] %s291_s18 }
  0x1b   : > { %1282 = dma.hbm_to_vmem [thread:$0]  (!%p1797_p6), %s264_s11, 256, %s266_s15, [#allocation9], %s2082_s22, %s2082_s22, %s2084_s23  }
  0x1c   : > { %1288 = dma.hbm_to_vmem [thread:$0]  (!%p1797_p6), %s292_s18, 256, %s294_s21, [#allocation12], %s2082_s22, %s2082_s22, %s2084_s23  }
  0x1d   : > { %2101 = sst [smem:[#allocation24_spill]] %s1813_s25  ;;  %s37_s26 = ssub.s32 %s1698_s30, %s1813_s25 }
  0x1e   : > { %s40_s9 = sadd.s32 1, %s1694_s29  ;;  %p38_p7 = scmp.eq.s32.totalorder %s37_s26, 0 }
  0x1f   : > { %p47_p8 = scmp.ne.s32.totalorder %s1694_s29, %s1690_s28  ;;  %p48_p9 = scmp.eq.s32.totalorder %s1698_s30, 0 }
  0x20   : > { %p53_p10 = scmp.ne.s32.totalorder %s1690_s28, %s1686_s27  ;;  %p213_p13 = scmp.eq.s32.totalorder %s1780_s12, 1 }
  0x21   : > { %s1824_s10 = scalar_select %p38_p7, %s1694_s29, %s40_s9  }
  0x22   : > { %p49_p11 = por %p48_p9, %p47_p8  ;;  %p1828_p12 = por %p2089_p1, %p53_p10 }
  0x23   : > { %2102 = sst [smem:[#allocation25_spill]] %s1824_s10  ;;  %p219_p0 = scmp.eq.s32.totalorder %s1174_s24, 1 }
  0x24   : > { %p1313_p2 = scmp.lt.s32.totalorder %s1698_s30, 2  ;;  %s2086_s14 = sand.u32 1, %s1694_s29  }
  0x25   : > { %p1835_p4 = por %p213_p13, %p47_p8  ;;  %p1839_p5 = por %p219_p0, %p53_p10 }
  0x26   : > { %s1845_s17 = sshll.u32 %s2086_s14, 2  ;;  %s1848_s18 = sshll.u32 %s1698_s30, 2 }
  0x27   : > { %p1850_p7 = pnand %p1313_p2, %p49_p11  ;;  %s340_s21 = sand.u32 1, %s1698_s30  }
  0x28   : > { %s2107_s1 = sld [smem:[#allocation26_spill]]  ;;  %s344_s23 = scalar_lea.vmem [#allocation5], %s1845_s17 }
  0x29   : > { %s352_s3 = sshll.u32 %s344_s23, 4  ;;  %s1860_s14 = scalar_lea.sflag [#allocation6], %s340_s21  ;;  %s353_s3 = int_to_ptr.vmem [resolvable:$true] %s352_s3 }
  0x2a   : > { %p1442_p9 = pneg %p1850_p7 }
  0x2e   : > { %s348_s9 = scalar_lea.hbm %s2107_s1, %s1848_s18  ;;  %s1445_s26 = scalar_lea.hbm %s2107_s1, 8 }
  0x2f   : > { %s350_s22 = sshll.u32 %s348_s9, 4  ;;  %s351_s22 = int_to_ptr.hbm [resolvable:$true] %s350_s22 }
  0x30   : > { %s1438_s5 = sshra.s32 %s351_s22, 4  ;;  %s1439_s5 = int_to_ptr.hbm [resolvable:$true] %s1438_s5 }
  0x31   : > { %s1440_s10 = scalar_lea.hbm %s1439_s5, 4  ;;  %p1446_p13 = scmp.lt.s32.totalorder %s1439_s5, %s2107_s1 }
  0x32   : > { %p1441_p8 = scmp.ne.s32.totalorder %s1439_s5, %s1440_s10  ;;  %p1447_p0 = scmp.lt.s32.totalorder %s1445_s26, %s1440_s10 }
  0x34   : > { %p1443_p10 = pnand %p1442_p9, %p1441_p8  ;;  %p1448_p2 = por %p1447_p0, %p1446_p13 }
  0x36   : > { %p1444_p11 = pneg %p1443_p10 }
  0x38   : > { %p1449_p1 = pnand %p1448_p2, %p1444_p11 }
  0x3a   : > { %1452 = shalt.err (!%p1449_p1)
}
  0x3b   : > { %1298 = dma.hbm_to_vmem [thread:$0]  (!%p1850_p7), %s351_s22, 64, %s353_s3, %s1860_s14  }
  0x3c   : > { %s2108_s4 = sld [smem:[#allocation28_spill]]  ;;  %s1704_s24 = smov [#allocation10]  }
  0x3d   : > { %s279_s5 = sshll.u32 %s1704_s24, 4  ;;  %s2109_s6 = sld [smem:[#allocation30_spill]]  ;;  %s280_s5 = int_to_ptr.vmem [resolvable:$true] %s279_s5 }
  0x3e   : > { %s2110_s23 = smov 4   ;;  %s2111_s1 = smov 64  }
  0x3f   : > { %s1705_s3 = smov [#allocation13]   ;;  %s329_s24 = scalar_lea.hbm %s2073_s0, %s1848_s18 }
  0x40   : > { %s307_s22 = sshll.u32 %s1705_s3, 4  ;;  %s325_s10 = scalar_lea.vmem [#allocation2], %s1845_s17  ;;  %s308_s22 = int_to_ptr.vmem [resolvable:$true] %s307_s22 }
  0x41   : > { %s333_s26 = sshll.u32 %s325_s10, 4  ;;  %s334_s26 = int_to_ptr.vmem [resolvable:$true] %s333_s26 }
  0x42   : > { %s277_s25 = sshll.u32 %s2108_s4, 4  ;;  %s331_s4 = sshll.u32 %s329_s24, 4  ;;  %s278_s25 = int_to_ptr.hbm [resolvable:$true] %s277_s25  ;;  %s332_s4 = int_to_ptr.hbm [resolvable:$true] %s331_s4 }
  0x43   : > { %s305_s9 = sshll.u32 %s2109_s6, 4  ;;  %s1528_s6 = sshra.s32 %s332_s4, 4  ;;  %s306_s9 = int_to_ptr.hbm [resolvable:$true] %s305_s9  ;;  %s1529_s6 = int_to_ptr.hbm [resolvable:$true] %s1528_s6 }
  0x44   : > { %1285 = dma.hbm_to_vmem [thread:$0]  (!%p1797_p6), %s278_s25, 256, %s280_s5, [#allocation9], %s2111_s1, %s2111_s1, %s2110_s23  }
  0x45   : > { %1291 = dma.hbm_to_vmem [thread:$0]  (!%p1797_p6), %s306_s9, 256, %s308_s22, [#allocation12], %s2111_s1, %s2111_s1, %s2110_s23  }
  0x46   : > { %s2112_s25 = sand.u32 1, %s1694_s29   ;;  %s1530_s3 = scalar_lea.hbm %s1529_s6, 4 }
  0x47   : > { %s322_s5 = scalar_lea.sflag [#allocation3], %s2112_s25  ;;  %p1531_p1 = scmp.ne.s32.totalorder %s1529_s6, %s1530_s3 }
  0x48   : > { %s1535_s9 = scalar_lea.hbm %s2073_s0, 8  ;;  %p1536_p6 = scmp.lt.s32.totalorder %s1529_s6, %s2073_s0 }
  0x49   : > { %p1533_p8 = pnand %p1531_p1, %p1442_p9  ;;  %p1537_p11 = scmp.lt.s32.totalorder %s1535_s9, %s1530_s3 }
  0x4b   : > { %p1534_p10 = pneg %p1533_p8  ;;  %p1538_p13 = por %p1537_p11, %p1536_p6 }
  0x4d   : > { %p1539_p0 = pnand %p1538_p13, %p1534_p10 }
  0x4f   : > { %1542 = shalt.err (!%p1539_p0)
}
  0x50   : > { %1295 = dma.hbm_to_vmem [thread:$0]  (!%p1850_p7), %s332_s4, 64, %s334_s26, %s322_s5  }
  0x51   : > { %s367_s24 = scalar_lea.hbm %s2075_s2, %s1848_s18  ;;  %s363_s10 = scalar_lea.vmem [#allocation7], %s1845_s17 }
  0x52   : > { %s371_s25 = sshll.u32 %s363_s10, 4  ;;  %s369_s1 = sshll.u32 %s367_s24, 4  ;;  %s372_s25 = int_to_ptr.vmem [resolvable:$true] %s371_s25  ;;  %s370_s1 = int_to_ptr.hbm [resolvable:$true] %s369_s1 }
  0x53   : > { %s1558_s6 = sshra.s32 %s370_s1, 4  ;;  %s1565_s4 = scalar_lea.hbm %s2075_s2, 8  ;;  %s1559_s6 = int_to_ptr.hbm [resolvable:$true] %s1558_s6 }
  0x54   : > { %s1560_s3 = scalar_lea.hbm %s1559_s6, 4  ;;  %p1566_p10 = scmp.lt.s32.totalorder %s1559_s6, %s2075_s2 }
  0x55   : > { %p1561_p2 = scmp.ne.s32.totalorder %s1559_s6, %s1560_s3  ;;  %p1567_p6 = scmp.lt.s32.totalorder %s1565_s4, %s1560_s3 }
  0x57   : > { %p1563_p1 = pnand %p1561_p2, %p1442_p9  ;;  %p1568_p11 = por %p1567_p6, %p1566_p10 }
  0x59   : > { %p1564_p8 = pneg %p1563_p1 }
  0x5b   : > { %p1569_p13 = pnand %p1568_p11, %p1564_p8 }
  0x5d   : > { %1572 = shalt.err (!%p1569_p13)
}
  0x5e   : > { %1301 = dma.hbm_to_vmem [thread:$0]  (!%p1850_p7), %s370_s1, 64, %s372_s25, %s1860_s14  }
  0x5f   : > { %380 = sbr.rel (%p1785_p3) target bundleno = 1457 (0x5b1), region = 48  ;;  %s1930_s17 = sand.u32 (!%p1785_p3), 1, %s1690_s28  }
  0x60   : > { %s1933_s18 = sshll.u32 (!%p1785_p3), %s1930_s17, 2  ;;  %s383_s23 = scalar_lea.sflag (!%p1785_p3), [#allocation3], %s1930_s17 }
  0x61   : > { %s386_s22 = scalar_lea.vmem (!%p1785_p3), [#allocation2], %s1933_s18 }
  0x64   : > { %1661 = dma.done.wait (%p1828_p12), %s383_s23, 64  }
  0x65   : > { %1663 = vsyncadd (%p1828_p12), %s383_s23, 4294967232  ;;  %s392_s13 = sand.u32 1, %s1780_s12   ;;  %s396_s20 = scalar_lea.vmem [#allocation5], %s1933_s18 }
  0x66   : > { %s393_s14 = scalar_lea.sflag [#allocation6], %s392_s13 }
  0x67   : > { %1665 = dma.done.wait (%p1828_p12), %s393_s14, 128  }
  0x68   : > { %1667 = vsyncadd (%p1828_p12), %s393_s14, 4294967168  ;;  %s406_s30 = scalar_lea.vmem [#allocation7], %s1933_s18  ;;  %p2113_p3 = scmp.eq.s32.totalorder %s1780_s12, 0 }
  0x6a   : > { %1669 = dma.done.wait (%p2113_p3), [#allocation9], 512   ;;  %p2114_p7 = pmov %p2113_p3 }
  0x6b   : > { %p2115_p9 = pmov %p2113_p3 }
  0x6c   : > { %1671 = vsyncadd (%p2114_p7), [#allocation9], 4294966784 }
  0x6d   : > { %1673 = dma.done.wait (%p2115_p9), [#allocation12], 512   ;;  %p2116_p0 = pmov %p2113_p3 }
  0x6e   : > { %v1247_v0 = vld [vmem:[#allocation8 + $0x8] sm:$0xff]  ;;  %v1249_v1 = vld [vmem:[#allocation10 + $0x8] sm:$0xff]  ;;  %v1246_v2 = vld [vmem:[#allocation8] sm:$0xff]  ;;  %vm495_vm0 = vcmask 261120   ;;  %vm579_vm1 = vcmask 64512   ;;  %s1706_s11 = smov 112  }
  0x6f   : > { %1675 = vsyncadd (%p2116_p0), [#allocation12], 4294966784  ;;  %505 = vmatpush.bf16.msra.mxu0 %v1247_v0  ;;  %537 = vmatpush.bf16.msra.mxu1 %v1249_v1  ;;  %v1248_v3 = vld [vmem:[#allocation10] sm:$0xff]  ;;  %v476_v4 = vld [vmem:[%s386_s22] sm:$0xf]  ;;  %s1707_s21 = smov 120  }
  0x70   : > { %v477_v5 = vld [vmem:[%s396_s20] sm:$0xf]  ;;  %s1708_s24 = smov 104   ;;  %v1251_v17 = vld [vmem:[#allocation11 + $0x8] sm:$0xff]  ;;  %v1250_v18 = vld [vmem:[#allocation11] sm:$0xff]  ;;  %vm629_vm2 = vcmask 1043456  }
  0x71   : > { %569 = vmatpush.bf16.msra.mxu2 %v1251_v17  ;;  %v478_v23 = vld [vmem:[%s406_s30] sm:$0xf]  ;;  %v647_v40 = vld [vmem:[#allocation13] sm:$0xf]  ;;  %s1196_s10 = sshll.u32 %s1930_s17, 4  ;;  %vm624_vm7 = vcmask 60416  }
  0x72   : > { %v748_v41 = vsel %vm629_vm2, %v647_v40, 0  ;;  %s1984_s25 = scalar_lea.vmem [#allocation15], %s1196_s10  ;;  %s1252_s1 = sshll.u32 %s1780_s12, 4 }
  0x73   : > { %506 = vmatpush.bf16.msra.mxu0 %v1246_v2  ;;  %538 = vmatpush.bf16.msra.mxu1 %v1248_v3  ;;  %s983_s19 = scalar_lea.hbm %s2081_s8, %s1252_s1  ;;  %s984_s9 = sshll.u32 %s1984_s25, 4  ;;  %s985_s9 = int_to_ptr.vmem [resolvable:$true] %s984_s9 }
  0x74   : > { %s986_s4 = sshll.u32 %s983_s19, 4  ;;  %s958_s26 = scalar_lea.sflag [#allocation16], %s1930_s17  ;;  %s987_s4 = int_to_ptr.hbm [resolvable:$true] %s986_s4 }
  0x75   : > { %570 = vmatpush.bf16.msra.mxu2 %v1250_v18  ;;  %s1602_s5 = sshra.s32 %s987_s4, 4  ;;  %s1608_s13 = scalar_lea.hbm %s2081_s8, 32  ;;  %s1603_s5 = int_to_ptr.hbm [resolvable:$true] %s1602_s5 }
  0x76   : > { %1205 = vmatmul.msk.bf16.vlgmr.msra.gmra.mxu0 %vm495_vm0, %v476_v4  ;;  %1214 = vmatmul.msk.bf16.vlgmr.msra.gmra.mxu1 %vm495_vm0, %v477_v5  ;;  %s1604_s18 = scalar_lea.hbm %s1603_s5, 16  ;;  %p1609_p8 = scmp.lt.s32.totalorder %s1603_s5, %s2081_s8 }
  0x77   : > { %p1605_p12 = scmp.ne.s32.totalorder %s1603_s5, %s1604_s18  ;;  %p1610_p10 = scmp.lt.s32.totalorder %s1608_s13, %s1604_s18 }
  0x78   : > { %1223 = vmatmul.msk.bf16.vlgmr.msra.gmra.mxu2 %vm495_vm0, %v478_v23 }
  0x79   : > { %p1606_p2 = pnand %p1605_p12, %p1835_p4  ;;  %p1611_p6 = por %p1610_p10, %p1609_p8 }
  0x7b   : > { %p1607_p1 = pneg %p1606_p2 }
  0x7d   : > { %p1612_p11 = pnand %p1611_p6, %p1607_p1 }
  0xf3   : > { %v508_v6 = vpop.f32.mrf.mxu0  ;;  %v540_v7 = vpop.f32.mrf.mxu1 }
  0xf4   : > { %v577_v8 = vpack.c.bf16 %v540_v7, %v540_v7  ;;  %v576_v10 = vpack.c.bf16 %v508_v6, %v508_v6 }
  0xf6   : > { %765 = vrot.lane.b32.xlu2 %v577_v8, %s1706_s11  ;;  %652 = vrot.lane.b32.xlu1 %v577_v8, %s1707_s21  ;;  %v584_v9 = vsel %vm579_vm1, %v577_v8, 0 }
  0xf7   : > { %593 = vmatpush.bf16.xpose.msra.mxu3 %v584_v9 }
  0xfb   : > { %v510_v11 = vpop.f32.mrf.mxu0  ;;  %v542_v12 = vpop.f32.mrf.mxu1 }
  0xfc   : > { %v572_v32 = vpop.f32.mrf.mxu2 }
  0xfd   : > { %v1975_v35 = vpack.c.bf16 %v572_v32, %v572_v32 }
  0xfe   : > { %859 = vrot.lane.b32.xlu2 %v577_v8, %s1708_s24  ;;  %649 = vrot.lane.b32.xlu1 %v576_v10, %s1707_s21 }
  0xff   : > { %1224 = vmatmul.msk.bf16.vlgmr.msra.gmra.mxu3 %vm579_vm1, %v576_v10  ;;  %v631_v39 = vsel %vm629_vm2, %v1975_v35, 0 }
 0x100   : > { %640 = vmatpush.bf16.msrb.mxu0 %v631_v39 }
 0x104   : > { %v574_v34 = vpop.f32.mrf.mxu2  ;;  %757 = vmatpush.bf16.msra.mxu0 %v748_v41 }
 0x106   : > { %857 = vrot.lane.b32.xlu1 %v576_v10, %s1708_s24 }
 0x150   : > { %v766_v13 = vpop.permute.xlu2 %765 }
 0x151   : > { %v771_v16 = vsel %vm579_vm1, %v766_v13, 0 }
 0x158   : > { %v860_v33 = vpop.permute.xlu2 %859 }
 0x159   : > { %v865_v58 = vsel %vm579_vm1, %v860_v33, 0 }
 0x168   : > { %v653_v14 = vpop.permute.xlu1 %652 }
 0x169   : > { %v658_v15 = vsel %vm579_vm1, %v653_v14, 0 }
 0x16a   : > { %667 = vmatpush.bf16.xpose.msrb.mxu1 %v658_v15 }
 0x170   : > { %v650_v19 = vpop.permute.xlu1 %649 }
 0x171   : > { %1226 = vmatmul.msk.bf16.vlgmr.msrb.gmra.mxu1 %vm579_vm1, %v650_v19 }
 0x172   : > { %780 = vmatpush.bf16.xpose.msra.mxu1 %v771_v16 }
 0x178   : > { %v858_v14 = vpop.permute.xlu1 %857 }
 0x182   : > { %v595_v20 = vpop.f32.mrf.mxu3 }
 0x183   : > { %v599_v21 = vsel %vm579_vm1, %v595_v20, -inf }
 0x184   : > { %600 = vmax.xlane.f32.xlu0 %v599_v21 }
 0x18a   : > { %v597_v22 = vpop.f32.mrf.mxu3 }
 0x1ee   : > { %v669_v24 = vpop.f32.mrf.mxu1 }
 0x1ef   : > { %v673_v25 = vsel %vm579_vm1, %v669_v24, -inf }
 0x1f0   : > { %674 = vmax.xlane.f32.xlu2 %v673_v25 }
 0x1f6   : > { %v671_v26 = vpop.f32.mrf.mxu1 }
 0x1f7   : > { %v601_v27 = vpop.xlane.xlu0 %600 }
 0x1f8   : > { %v602_v28 = vsub.f32 %v595_v20, %v601_v27  ;;  %v724_v27 = vld [vmem:[#allocation13 + $0x4] sm:$0xf] }
 0x1fa   : > { %v603_v29 = vmul.f32 1.442695, %v602_v28 }
 0x1fc   : > { %1362 = vpow2.f32 %v603_v29  ;;  %v729_v29 = vsel %vm629_vm2, %v724_v27, 0 }
 0x1fd   : > { %738 = vmatpush.bf16.msrb.mxu3 %v729_v29 }
 0x202   : > { %v1363_v30 = vpop.eup %1362 }
 0x203   : > { %v605_v31 = vsel %vm579_vm1, %v1363_v30, 0.0 }
 0x204   : > { %606 = vadd.xlane.f32.xlu0 %v605_v31 }
 0x218   : > { %763 = vrot.lane.b32.xlu0 %v576_v10, %s1706_s11 }
 0x263   : > { %v675_v36 = vpop.xlane.xlu2 %674 }
 0x264   : > { %v676_v37 = vsub.f32 %v669_v24, %v675_v36 }
 0x266   : > { %v677_v38 = vmul.f32 1.442695, %v676_v37 }
 0x268   : > { %1364 = vpow2.f32 %v677_v38 }
 0x26e   : > { %v1365_v42 = vpop.eup %1364 }
 0x26f   : > { %v679_v43 = vsel %vm579_vm1, %v1365_v42, 0.0 }
 0x270   : > { %680 = vadd.xlane.f32.xlu2 %v679_v43 }
 0x277   : > { %v607_v44 = vpop.xlane.xlu0 %606 }
 0x278   : > { %1366 = vrcp.f32 %v607_v44  ;;  %v619_v48 = vand.u32 2147483648, %v607_v44  ;;  %v617_v50 = vand.u32 2147483647, %v607_v44  ;;  %vm613_vm4 = vweird.f32 %v607_v44 }
 0x27a   : > { %v620_v52 = vor.u32 1.1754944e-38, %v619_v48  ;;  %vm618_vm6 = vcmp.eq.f32.partialorder %v617_v50, 8.507059e+37 }
 0x27e   : > { %v1367_v45 = vpop.eup %1366 }
 0x27f   : > { %v609_v46 = vmul.f32 %v1367_v45, %v607_v44  ;;  %vm614_vm3 = vweird.f32 %v1367_v45 }
 0x280   : > { %vm615_vm5 = vmor %vm613_vm4, %vm614_vm3 }
 0x281   : > { %v610_v47 = vsub.f32 1.0, %v609_v46 }
 0x283   : > { %v611_v49 = vmul.f32 %v1367_v45, %v610_v47 }
 0x285   : > { %v612_v51 = vadd.f32 %v1367_v45, %v611_v49 }
 0x287   : > { %v616_v53 = vsel %vm615_vm5, %v1367_v45, %v612_v51 }
 0x288   : > { %v621_v54 = vsel %vm618_vm6, %v620_v52, %v616_v53  ;;  %v836_v53 = vld [vmem:[#allocation13 + $0x8] sm:$0xf] }
 0x289   : > { %v622_v55 = vmul.f32 %v1363_v30, %v621_v54  ;;  %v841_v54 = vsel %vm629_vm2, %v836_v53, 0 }
 0x28a   : > { %v764_v56 = vpop.permute.xlu0 %763  ;;  %850 = vmatpush.bf16.msra.mxu3 %v841_v54 }
 0x28b   : > { %1231 = vmatmul.msk.bf16.vlgmr.msra.gmra.mxu1 %vm579_vm1, %v764_v56  ;;  %v623_v57 = vpack.c.bf16 %v622_v55, %v622_v55  ;;  %v930_v56 = vld [vmem:[#allocation13 + $0xc] sm:$0xf] }
 0x28d   : > { %625 = vst.msk [vmem:[%s1984_s25] sm:$0xf] %vm624_vm7, %v623_v57  ;;  %1225 = vmatmul.msk.bf16.vlgmr.msrb.gmra.mxu0 %vm579_vm1, %v623_v57  ;;  %v935_v57 = vsel %vm629_vm2, %v930_v56, 0 }
 0x28e   : > { %874 = vmatpush.bf16.xpose.msrb.mxu0 %v865_v58 }
 0x2e3   : > { %v681_v59 = vpop.xlane.xlu2 %680 }
 0x2e4   : > { %1368 = vrcp.f32 %v681_v59  ;;  %v693_v63 = vand.u32 2147483648, %v681_v59  ;;  %v691_v1 = vand.u32 2147483647, %v681_v59  ;;  %vm687_vm9 = vweird.f32 %v681_v59 }
 0x2e6   : > { %v694_v3 = vor.u32 1.1754944e-38, %v693_v63  ;;  %vm692_vm11 = vcmp.eq.f32.partialorder %v691_v1, 8.507059e+37 }
 0x2ea   : > { %v1369_v60 = vpop.eup %1368 }
 0x2eb   : > { %v683_v61 = vmul.f32 %v1369_v60, %v681_v59  ;;  %vm688_vm8 = vweird.f32 %v1369_v60 }
 0x2ec   : > { %vm689_vm10 = vmor %vm687_vm9, %vm688_vm8 }
 0x2ed   : > { %v684_v62 = vsub.f32 1.0, %v683_v61 }
 0x2ef   : > { %v685_v0 = vmul.f32 %v1369_v60, %v684_v62 }
 0x2f1   : > { %v686_v2 = vadd.f32 %v1369_v60, %v685_v0 }
 0x2f3   : > { %v690_v4 = vsel %vm689_vm10, %v1369_v60, %v686_v2 }
 0x2f4   : > { %v695_v5 = vsel %vm692_vm11, %v694_v3, %v690_v4 }
 0x2f5   : > { %v696_v6 = vmul.f32 %v1365_v42, %v695_v5 }
 0x2f7   : > { %v697_v7 = vpack.c.bf16 %v696_v6, %v696_v6 }
 0x2f9   : > { %1227 = vst.msk [vmem:[%s1984_s25 + $0x4] sm:$0xf] %vm624_vm7, %v697_v7 }
 0x308   : > { %v782_v8 = vpop.f32.mrf.mxu1 }
 0x309   : > { %v786_v9 = vsel %vm579_vm1, %v782_v8, -inf }
 0x30a   : > { %787 = vmax.xlane.f32.xlu1 %v786_v9  ;;  %v642_v10 = vpop.f32.mrf.mxu0 }
 0x30b   : > { %v646_v11 = vpack.c.bf16 %v642_v10, %v642_v10 }
 0x30d   : > { %1230 = vmatmul.msk.bf16.vlgmr.msra.gmra.mxu0 %vm579_vm1, %v646_v11 }
 0x310   : > { %v784_v12 = vpop.f32.mrf.mxu1 }
 0x312   : > { %v644_v13 = vpop.f32.mrf.mxu0 }
 0x31d   : > { %1235 = vmatmul.msk.bf16.vlgmr.msrb.gmra.mxu0 %vm579_vm1, %v858_v14 }
 0x323   : > { %701 = vrot.lane.b32.xlu1 %v1975_v35, %s1707_s21 }
 0x37d   : > { %v788_v15 = vpop.xlane.xlu1 %787 }
 0x37e   : > { %v789_v16 = vsub.f32 %v782_v8, %v788_v15 }
 0x380   : > { %v790_v17 = vmul.f32 1.442695, %v789_v16 }
 0x382   : > { %1370 = vpow2.f32 %v790_v17 }
 0x388   : > { %v1371_v18 = vpop.eup %1370 }
 0x389   : > { %v792_v19 = vsel %vm579_vm1, %v1371_v18, 0.0 }
 0x38a   : > { %793 = vadd.xlane.f32.xlu2 %v792_v19  ;;  %v1997_v20 = vpop.f32.mrf.mxu0 }
 0x392   : > { %v761_v21 = vpop.f32.mrf.mxu0 }
 0x395   : > { %v702_v22 = vpop.permute.xlu1 %701 }
 0x396   : > { %v707_v23 = vsel %vm629_vm2, %v702_v22, 0 }
 0x397   : > { %716 = vmatpush.bf16.msrb.mxu2 %v707_v23 }
 0x39a   : > { %1228 = vmatmul.msk.bf16.vlgmr.msrb.gmra.mxu2 %vm579_vm1, %v697_v7  ;;  %v876_v24 = vpop.f32.mrf.mxu0 }
 0x39b   : > { %v880_v25 = vsel %vm579_vm1, %v876_v24, -inf }
 0x39c   : > { %881 = vmax.xlane.f32.xlu0 %v880_v25 }
 0x3a2   : > { %v878_v26 = vpop.f32.mrf.mxu0 }
 0x3b0   : > { %813 = vrot.lane.b32.xlu0 %v1975_v35, %s1706_s11 }
 0x3fd   : > { %v794_v28 = vpop.xlane.xlu2 %793 }
 0x3fe   : > { %1372 = vrcp.f32 %v794_v28  ;;  %v806_v33 = vand.u32 2147483648, %v794_v28  ;;  %v804_v36 = vand.u32 2147483647, %v794_v28  ;;  %vm800_vm13 = vweird.f32 %v794_v28 }
 0x400   : > { %v807_v38 = vor.u32 1.1754944e-38, %v806_v33  ;;  %vm805_vm15 = vcmp.eq.f32.partialorder %v804_v36, 8.507059e+37 }
 0x404   : > { %v1373_v30 = vpop.eup %1372 }
 0x405   : > { %v796_v31 = vmul.f32 %v1373_v30, %v794_v28  ;;  %vm801_vm12 = vweird.f32 %v1373_v30 }
 0x406   : > { %vm802_vm14 = vmor %vm800_vm13, %vm801_vm12 }
 0x407   : > { %v797_v32 = vsub.f32 1.0, %v796_v31 }
 0x409   : > { %v798_v34 = vmul.f32 %v1373_v30, %v797_v32 }
 0x40b   : > { %v799_v37 = vadd.f32 %v1373_v30, %v798_v34 }
 0x40d   : > { %v803_v39 = vsel %vm802_vm14, %v1373_v30, %v799_v37 }
 0x40e   : > { %v808_v40 = vsel %vm805_vm15, %v807_v38, %v803_v39 }
 0x40f   : > { %v809_v41 = vmul.f32 %v1371_v18, %v808_v40  ;;  %v882_v42 = vpop.xlane.xlu0 %881 }
 0x410   : > { %v883_v43 = vsub.f32 %v876_v24, %v882_v42 }
 0x411   : > { %v810_v44 = vpack.c.bf16 %v809_v41, %v809_v41 }
 0x412   : > { %v884_v45 = vmul.f32 1.442695, %v883_v43 }
 0x413   : > { %1232 = vst.msk [vmem:[%s1984_s25 + $0x8] sm:$0xf] %vm624_vm7, %v810_v44 }
 0x414   : > { %1374 = vpow2.f32 %v884_v45 }
 0x41a   : > { %v1375_v46 = vpop.eup %1374 }
 0x41b   : > { %v886_v47 = vsel %vm579_vm1, %v1375_v46, 0.0 }
 0x41c   : > { %887 = vadd.xlane.f32.xlu2 %v886_v47 }
 0x41d   : > { %v718_v48 = vpop.f32.mrf.mxu2 }
 0x41e   : > { %v722_v49 = vpack.c.bf16 %v718_v48, %v718_v48 }
 0x420   : > { %1229 = vmatmul.msk.bf16.vlgmr.msrb.gmra.mxu3 %vm579_vm1, %v722_v49 }
 0x422   : > { %v814_v50 = vpop.permute.xlu0 %813 }
 0x423   : > { %v819_v51 = vsel %vm629_vm2, %v814_v50, 0 }
 0x424   : > { %828 = vmatpush.bf16.msra.mxu2 %v819_v51 }
 0x425   : > { %v720_v52 = vpop.f32.mrf.mxu2 }
 0x427   : > { %1233 = vmatmul.msk.bf16.vlgmr.msra.gmra.mxu2 %vm579_vm1, %v810_v44 }
 0x428   : > { %944 = vmatpush.bf16.msrb.mxu2 %v935_v57 }
 0x434   : > { %907 = vrot.lane.b32.xlu2 %v1975_v35, %s1708_s24 }
 0x48f   : > { %v888_v55 = vpop.xlane.xlu2 %887 }
 0x490   : > { %1376 = vrcp.f32 %v888_v55  ;;  %v900_v63 = vand.u32 2147483648, %v888_v55  ;;  %v898_v0 = vand.u32 2147483647, %v888_v55  ;;  %vm894_vm4 = vweird.f32 %v888_v55 }
 0x492   : > { %v901_v2 = vor.u32 1.1754944e-38, %v900_v63  ;;  %vm899_vm6 = vcmp.eq.f32.partialorder %v898_v0, 8.507059e+37 }
 0x496   : > { %v1377_v58 = vpop.eup %1376 }
 0x497   : > { %v890_v59 = vmul.f32 %v1377_v58, %v888_v55  ;;  %v908_v60 = vpop.permute.xlu2 %907  ;;  %vm895_vm3 = vweird.f32 %v1377_v58 }
 0x498   : > { %v913_v61 = vsel %vm629_vm2, %v908_v60, 0  ;;  %vm896_vm5 = vmor %vm894_vm4, %vm895_vm3 }
 0x499   : > { %v891_v62 = vsub.f32 1.0, %v890_v59  ;;  %922 = vmatpush.bf16.msrb.mxu1 %v913_v61 }
 0x49b   : > { %v892_v35 = vmul.f32 %v1377_v58, %v891_v62 }
 0x49d   : > { %v893_v1 = vadd.f32 %v1377_v58, %v892_v35 }
 0x49f   : > { %v897_v3 = vsel %vm896_vm5, %v1377_v58, %v893_v1 }
 0x4a0   : > { %v902_v4 = vsel %vm899_vm6, %v901_v2, %v897_v3 }
 0x4a1   : > { %v903_v5 = vmul.f32 %v1375_v46, %v902_v4 }
 0x4a3   : > { %v740_v6 = vpop.f32.mrf.mxu3  ;;  %v904_v7 = vpack.c.bf16 %v903_v5, %v903_v5 }
 0x4a4   : > { %v760_v15 = vadd.f32 %v1997_v20, %v740_v6 }
 0x4a5   : > { %1236 = vst.msk [vmem:[%s1984_s25 + $0xc] sm:$0xf] %vm624_vm7, %v904_v7  ;;  %1237 = vmatmul.msk.bf16.vlgmr.msrb.gmra.mxu1 %vm579_vm1, %v904_v7 }
 0x4aa   : > { %v830_v8 = vpop.f32.mrf.mxu2 }
 0x4ab   : > { %v834_v9 = vpack.c.bf16 %v830_v8, %v830_v8  ;;  %v742_v10 = vpop.f32.mrf.mxu3 }
 0x4ad   : > { %1234 = vmatmul.msk.bf16.vlgmr.msra.gmra.mxu3 %vm579_vm1, %v834_v9 }
 0x4b2   : > { %v832_v11 = vpop.f32.mrf.mxu2 }
 0x522   : > { %v924_v12 = vpop.f32.mrf.mxu1 }
 0x523   : > { %v928_v13 = vpack.c.bf16 %v924_v12, %v924_v12 }
 0x525   : > { %1238 = vmatmul.msk.bf16.vlgmr.msrb.gmra.mxu2 %vm579_vm1, %v928_v13 }
 0x52a   : > { %v926_v14 = vpop.f32.mrf.mxu1 }
 0x530   : > { %v852_v16 = vpop.f32.mrf.mxu3 }
 0x531   : > { %v856_v17 = vadd.f32 %v852_v16, %v760_v15 }
 0x532   : > { %1615 = shalt.err (!%p1612_p11)
}
 0x533   : > { %s1709_s30 = smov 64   ;;  %s1710_s11 = smov 4  }
 0x534   : > { %1276 = dma.vmem_to_hbm [thread:$0]  (%p1835_p4), %s985_s9, 256, %s987_s4, %s958_s26, %s1709_s30, %s1709_s30, %s1710_s11  }
 0x535   : > { %s1241_s21 = sshll.u32 %s1780_s12, 3  ;;  %s1195_s24 = sshll.u32 %s1930_s17, 3 }
 0x536   : > { %s968_s1 = scalar_lea.hbm %s2080_s7, %s1241_s21  ;;  %s467_s6 = scalar_lea.vmem [#allocation14], %s1195_s24 }
 0x537   : > { %s970_s3 = sshll.u32 %s467_s6, 4  ;;  %s972_s19 = sshll.u32 %s968_s1, 4  ;;  %s971_s3 = int_to_ptr.vmem [resolvable:$true] %s970_s3  ;;  %s973_s19 = int_to_ptr.hbm [resolvable:$true] %s972_s19 }
 0x538   : > { %v854_v18 = vpop.f32.mrf.mxu3  ;;  %s953_s5 = scalar_lea.sflag [#allocation4], %s1930_s17  ;;  %s1630_s18 = sshra.s32 %s973_s19, 4  ;;  %s1631_s18 = int_to_ptr.hbm [resolvable:$true] %s1630_s18 }
 0x539   : > { %s1632_s9 = scalar_lea.hbm %s1631_s18, 8  ;;  %s1636_s26 = scalar_lea.hbm %s2080_s7, 16 }
 0x53a   : > { %p1633_p13 = scmp.ne.s32.totalorder %s1631_s18, %s1632_s9  ;;  %p1637_p9 = scmp.lt.s32.totalorder %s1631_s18, %s2080_s7 }
 0x53b   : > { %p1638_p0 = scmp.lt.s32.totalorder %s1636_s26, %s1632_s9 }
 0x53c   : > { %p1634_p3 = pnand %p1633_p13, %p1835_p4 }
 0x53d   : > { %p1639_p12 = por %p1638_p0, %p1637_p9 }
 0x53e   : > { %p1635_p7 = pneg %p1634_p3 }
 0x540   : > { %p1640_p2 = pnand %p1639_p12, %p1635_p7 }
 0x5a8   : > { %v946_v19 = vpop.f32.mrf.mxu2 }
 0x5a9   : > { %v950_v20 = vadd.f32 %v946_v19, %v856_v17 }
 0x5ab   : > { %951 = vst.msk [vmem:[%s467_s6] sm:$0xff] %vm495_vm0, %v950_v20 }
 0x5ac   : > { %1643 = shalt.err (!%p1640_p2)
}
 0x5ad   : > { %1275 = dma.vmem_to_hbm [thread:$0]  (%p1835_p4), %s971_s3, 128, %s973_s19, %s953_s5  }
 0x5b0   : > { %v948_v21 = vpop.f32.mrf.mxu2 }
 0x5b1 PF: > { %s2117_s17 = sld [smem:[#allocation23_spill]]  ;;  %s1001_s13 = sand.u32 1, %s1686_s27  }
 0x5b2   : > { %s1002_s14 = scalar_lea.sflag [#allocation4], %s1001_s13 }
 0x5b7   : > { %p2118_p1 = scmp.ge.s32.totalorder %s2117_s17, 2 }
 0x5b9   : > { %p1303_p8 = pnand %p2118_p1, %p1839_p5 }
 0x5bb   : > { %p1304_p10 = pneg %p1303_p8 }
 0x5bd   : > { %1677 = dma.done.wait (%p1304_p10), %s1002_s14, 128  }
 0x5be   : > { %1679 = vsyncadd (%p1304_p10), %s1002_s14, 4294967168  ;;  %s1012_s20 = scalar_lea.sflag [#allocation16], %s1001_s13 }
 0x5bf   : > { %1681 = dma.done.wait (%p1304_p10), %s1012_s20, 256  }
 0x5c0   : > { %1683 = vsyncadd (%p1304_p10), %s1012_s20, 4294967040  ;;  %s2119_s30 = sld [smem:[#allocation24_spill]]  ;;  %s2121_s27 = smov %s1690_s28 }
 0x5c1   : > { %s2120_s15 = sld [smem:[#allocation25_spill]]  ;;  %s2122_s28 = smov %s1694_s29 }
 0x5c6   : > { %p30_p4 = scmp.ge.s32.totalorder %s2119_s30, 4  }
 0x5c7   : > { %s2123_s29 = smov %s2120_s15 }
 0x5c8   :  { %32 = sbr.rel (!%p30_p4) target bundleno = 17 (0x11), region = 156 }
 0x5cd   :  { %1018 = vsyncpa [#allocation3], 1 }
 0x5ce   :  { %1020 = vsyncpa [#allocation3 + $0x1], 1 }
 0x5cf   :  { %1021 = vsyncpa [#allocation6], 1 }
 0x5d0   :  { %1023 = vsyncpa [#allocation6 + $0x1], 1 }
 0x5d1   :  { %1024 = vsyncpa [#allocation9], 1 }
 0x5d2   :  { %1025 = vsyncpa [#allocation12], 1 }
 0x5d3   :  { %1026 = vsyncpa [#allocation4], 1 }
 0x5d4   :  { %1028 = vsyncpa [#allocation4 + $0x1], 1 }
 0x5d5   :  { %1029 = vsyncpa [#allocation16], 1 }
 0x5d6   :  { %1031 = vsyncpa [#allocation16 + $0x1], 1 }

</bundles_post_ra>
